<compile_context>
chip_gen: v6e
topology: v6e:2x2x1
jax: 0.10.0
libtpu: 0.0.40
codegen_flags: <defaults>
</compile_context>

<pallas_src>
import functools

import jax
import jax.numpy as jnp
from jax.experimental import pallas as pl
from jax.experimental.pallas import tpu as pltpu

EPS_BN = 1e-5
FIRE_THRESHOLD = 0.0


def _round_up(v, m):
    return -(-v // m) * m


def _vmem_capacity_bytes(default=64 * 1024 * 1024):
    """Physical VMEM per TensorCore; conservative 64 MiB (v7x) fallback."""
    try:
        cap = int(pltpu.get_tpu_info().vmem_capacity_bytes)
        if cap > 0:
            return cap
    except Exception:
        pass
    return default


# ----------------------------------------------------------------------------
# Kernel 1: per-channel biased mean / var over (N, HW).
# Per-image-block partial sums -> (NB, C, 1); finalized in the wrapper.
# ----------------------------------------------------------------------------
def _stats_kernel(x_ref, sum_ref, sq_ref):
    @pl.when(pl.program_id(1) == 0)
    def _init():
        sum_ref[...] = jnp.zeros_like(sum_ref)
        sq_ref[...] = jnp.zeros_like(sq_ref)

    x = x_ref[...]                                    # (TN, C, THW) f32
    xs = jnp.sum(x, axis=0)                           # (C, THW)  cheap VPU adds
    xq = jnp.sum(x * x, axis=0)                       # (C, THW)
    sum_ref[0] += jnp.sum(xs, axis=1, keepdims=True)  # (C, 1)  one lane reduce
    sq_ref[0] += jnp.sum(xq, axis=1, keepdims=True)


def _pick_hw_tile(hw, max_tile=8192):
    """Largest multiple of 128 that divides hw (falls back to the full dim)."""
    best = hw
    t = 128
    while t <= min(hw, max_tile):
        if hw % t == 0:
            best = t
        t += 128
    return best


def channel_stats(x_nc_hw, vmem_cap=None):
    """Biased per-channel mean/var of an (N, C, HW) tensor over (N, HW)."""
    if vmem_cap is None:
        vmem_cap = _vmem_capacity_bytes()
    N, C, HW = x_nc_hw.shape

    # Tile the HW axis as wide as a ~6 MiB block budget allows, then stack
    # multiple images per step; keep >= 2 image-blocks when possible so the
    # 'parallel' axis can shard across TensorCores (v7x megacore).
    max_thw = max(128, (6 * 2**20) // max(C * 4, 1) // 128 * 128)
    thw = _pick_hw_tile(HW, max_tile=max_thw)
    tn_cap = max(1, N // 2)
    tn = 1
    for cand in range(1, tn_cap + 1):
        if N % cand == 0 and cand * C * thw * 4 <= 6 * 2**20:
            tn = cand
    nb, hb = N // tn, HW // thw

    block_bytes = tn * C * thw * 4
    vmem_limit = int(min(vmem_cap, max(32 * 2**20, 3 * block_bytes + 4 * 2**20)))

    sums, sqs = pl.pallas_call(
        _stats_kernel,
        grid=(nb, hb),
        in_specs=[pl.BlockSpec((tn, C, thw), lambda n, h: (n, 0, h))],
        out_specs=(pl.BlockSpec((1, C, 1), lambda n, h: (n, 0, 0)),
                   pl.BlockSpec((1, C, 1), lambda n, h: (n, 0, 0))),
        out_shape=(jax.ShapeDtypeStruct((nb, C, 1), jnp.float32),
                   jax.ShapeDtypeStruct((nb, C, 1), jnp.float32)),
        compiler_params=pltpu.CompilerParams(
            dimension_semantics=("parallel", "arbitrary"),
            vmem_limit_bytes=vmem_limit),
    )(x_nc_hw)

    inv = 1.0 / float(N * HW)
    mean = jnp.sum(sums[:, :, 0], axis=0) * inv
    ex2 = jnp.sum(sqs[:, :, 0], axis=0) * inv
    var = jnp.maximum(ex2 - mean * mean, 0.0)   # biased (unbiased=False)
    return mean, var


# ----------------------------------------------------------------------------
# Kernel 2: fused BN + fire + KHxKW 'same' conv, TB images per grid step.
# ----------------------------------------------------------------------------
def _bn_fire_conv_kernel(x_ref, aff_ref, w_ref, b_ref, mask_ref,
                         o_ref, spad_ref, slab_ref, *,
                         W, HW, OW, SEG, HEAD, KH, KW, PH, PW, C, TB):
    scale = aff_ref[0]                                   # (C, 1) f32
    shift = aff_ref[1]                                   # (C, 1) f32
    w = w_ref[...]                                       # (COUT, KH*KW*C) bf16
    bias = b_ref[...]                                    # (COUT, 1) f32
    masks = [mask_ref[kw:kw + 1, :] for kw in range(KW)]  # (1, OW) bf16 each

    # Zero ONLY the padding head/tail zones (once per grid step).  The spike
    # body [HEAD, HEAD+HW) is fully overwritten for every image below, and
    # the zones stay zero across the TB images of this step, so no
    # full-scratch clear is needed.
    if HEAD > 0:
        spad_ref[:, :HEAD] = jnp.zeros((C, HEAD), jnp.bfloat16)
    tail = SEG - HEAD - HW
    if tail > 0:
        spad_ref[:, HEAD + HW:] = jnp.zeros((C, tail), jnp.bfloat16)

    for t in range(TB):
        # --- BN + Heaviside fire, channel-major; spikes exact in bf16. ---
        xb = x_ref[t] * scale + shift                    # (C, HW) f32
        spad_ref[:, HEAD:HEAD + HW] = (xb > FIRE_THRESHOLD).astype(jnp.bfloat16)

        # --- K-packed im2col slab: tap (kh,kw) is a static (shifted) lane
        # slice of the zero-headed/tailed scratch (no rolls); the width-pad
        # column mask for kw != PW taps is fused into the copy. ---
        for kh in range(KH):
            for kw in range(KW):
                kidx = kh * KW + kw
                d = (kh - PH) * W + (kw - PW)
                patch = spad_ref[:, HEAD + d:HEAD + d + OW]
                if kw != PW:
                    patch = patch * masks[kw]
                slab_ref[kidx * C:(kidx + 1) * C, :] = patch

        # --- ONE MXU matmul, contraction depth KH*KW*C; bias folded in;
        # result streams straight to the lane-dense output block. ---
        o_ref[t] = (jnp.dot(w, slab_ref[...],
                            preferred_element_type=jnp.float32) + bias)


def _conv_vmem_estimate(tb, C, HW, COUT, OW, SEG, K9, KW):
    return (2 * tb * C * HW * 4            # x block, double-buffered
            + 2 * tb * COUT * OW * 4       # output block, double-buffered
            + C * SEG * 2                  # padded-spike scratch (bf16)
            + K9 * OW * 2                  # K-packed slab scratch (bf16)
            + COUT * OW * 4                # live matmul result
            + 2 * (2 * C * 4 + COUT * K9 * 2 + COUT * 4 + KW * OW * 2)
            + (2 << 20))                   # headroom


def bn_fire_conv(x_tbchw, weight_bn, bias_bn, weight_conv, bias_conv,
                 stride=(1, 1), padding=(1, 1), if_bias_conv=True,
                 eps_bn=EPS_BN):
    assert stride == (1, 1), "kernel implements the module defaults stride=(1,1)"
    T, B, C, H, W = x_tbchw.shape
    COUT, CIN, KH, KW = weight_conv.shape
    assert CIN == C
    PH, PW = padding
    assert KH == 2 * PH + 1 and KW == 2 * PW + 1, "'same' conv assumed"

    N = T * B
    HW = H * W
    OW = _round_up(HW, 128)                     # lane-dense output width
    pad_flat = PH * W + PW                      # flat-index reach of the taps
    HEAD = _round_up(pad_flat, 128) if pad_flat else 0  # aligned spike start
    SEG = _round_up(HEAD + pad_flat + OW, 128)          # head + spike + tail
    K9 = KH * KW * C

    vmem_cap = _vmem_capacity_bytes()

    # free reshape: (T,B,C,H,W) -> (N, C, HW); no HBM transpose / padded copy.
    x3 = x_tbchw.reshape(N, C, HW).astype(jnp.float32)

    # --- kernel 1: per-channel biased stats ---
    mean, var = channel_stats(x3, vmem_cap)

    # --- fold BN into a single (2, C, 1) scale/shift operand ---
    scale = weight_bn.astype(jnp.float32) * jax.lax.rsqrt(var + eps_bn)
    shift = bias_bn.astype(jnp.float32) - mean * scale
    bn_aff = jnp.stack([scale, shift]).reshape(2, C, 1)

    # conv weight packed along the contraction dim: (COUT, KH*KW*C) bf16
    # (row order kidx*C + cin matches the slab layout in the kernel).
    w_packed = jnp.transpose(weight_conv, (0, 2, 3, 1)).reshape(COUT, K9)
    w_packed = w_packed.astype(jnp.bfloat16)
    if if_bias_conv:
        b_col = bias_conv.reshape(COUT, 1).astype(jnp.float32)
    else:
        b_col = jnp.zeros((COUT, 1), jnp.float32)

    # width-padding column masks for the off-center kw taps.
    col = jnp.arange(OW, dtype=jnp.int32) % W
    kw_mask = jnp.stack(
        [((col >= (PW - kw)) & (col < (W + PW - kw))).astype(jnp.bfloat16)
         for kw in range(KW)])                                   # (KW, OW)

    # Images per grid step: amortizes per-step overhead and keeps the packed
    # weights resident; keep >= 2 steps when possible so the 'parallel' image
    # axis can still shard across TensorCores.  VMEM budget ~80% of capacity.
    tb_cap = min(8, max(1, N // 2))
    TB = 1
    for cand in range(1, tb_cap + 1):
        if (N % cand == 0 and
                _conv_vmem_estimate(cand, C, HW, COUT, OW, SEG, K9, KW)
                <= 0.8 * vmem_cap):
            TB = cand
    est = _conv_vmem_estimate(TB, C, HW, COUT, OW, SEG, K9, KW)
    vmem_limit = int(min(vmem_cap, max(32 * 2**20, est)))

    kernel = functools.partial(
        _bn_fire_conv_kernel, W=W, HW=HW, OW=OW, SEG=SEG, HEAD=HEAD,
        KH=KH, KW=KW, PH=PH, PW=PW, C=C, TB=TB)

    out = pl.pallas_call(
        kernel,
        grid=(N // TB,),
        in_specs=[
            pl.BlockSpec((TB, C, HW), lambda n: (n, 0, 0)),      # x
            pl.BlockSpec((2, C, 1), lambda n: (0, 0, 0)),        # scale/shift
            pl.BlockSpec((COUT, K9), lambda n: (0, 0)),          # packed weights
            pl.BlockSpec((COUT, 1), lambda n: (0, 0)),           # conv bias
            pl.BlockSpec((KW, OW), lambda n: (0, 0)),            # kw masks
        ],
        out_specs=pl.BlockSpec((TB, COUT, OW), lambda n: (n, 0, 0)),
        out_shape=jax.ShapeDtypeStruct((N, COUT, OW), jnp.float32),
        scratch_shapes=[pltpu.VMEM((C, SEG), jnp.bfloat16),      # padded spike
                        pltpu.VMEM((K9, OW), jnp.bfloat16)],     # im2col slab
        compiler_params=pltpu.CompilerParams(
            dimension_semantics=("parallel",),   # shards image blocks over TCs
            vmem_limit_bytes=vmem_limit),
    )(x3, bn_aff, w_packed, b_col, kw_mask)

    # TODO(synk): for very large images (whole-image blocks exceeding the VMEM
    # budget even at TB=1) add a spatial row-tile grid axis with a (KH-1)-row
    # halo so per-step blocks stay bounded (v7x: 64 MiB VMEM per TensorCore).
    out = out[:, :, :HW].reshape(N, COUT, H, W)
    return out.reshape(T, B, COUT, H, W), mean, var


# ----------------------------------------------------------------------------
# Pure-JAX reference (for correctness checking only).
# ----------------------------------------------------------------------------
def reference(x, gamma, beta, wc, bc, mean=None, var=None):
    T, B, C, H, W = x.shape
    if mean is None:
        mean = jnp.mean(x, axis=(0, 1, 3, 4))
    if var is None:
        var = jnp.var(x, axis=(0, 1, 3, 4))
    scale = gamma * jax.lax.rsqrt(var + EPS_BN)
    shift = beta - mean * scale
    xb = x * scale[None, None, :, None, None] + shift[None, None, :, None, None]
    s = (xb > FIRE_THRESHOLD).astype(jnp.float32).reshape(T * B, C, H, W)
    y = jax.lax.conv_general_dilated(
        s, wc, window_strides=(1, 1), padding=((1, 1), (1, 1)),
        dimension_numbers=("NCHW", "OIHW", "NCHW"))
    y = y + bc[None, :, None, None]
    return y.reshape(T, B, -1, H, W)


if __name__ == "__main__":
    T, B, CIN, COUT, H, W = 2, 2, 4, 8, 16, 16
    KH, KW = 3, 3

    key = jax.random.PRNGKey(0)
    kx, kw_, kb = jax.random.split(key, 3)
    x = jax.random.normal(kx, (T, B, CIN, H, W), dtype=jnp.float32)

    # module __init__: bn params start at ones/zeros; conv params random (det.)
    weight_bn = jnp.ones((CIN,), jnp.float32)
    bias_bn = jnp.zeros((CIN,), jnp.float32)
    fan_in = CIN * KH * KW
    bound = 1.0 / (fan_in ** 0.5)
    weight_conv = jax.random.uniform(kw_, (COUT, CIN, KH, KW), jnp.float32,
                                     -bound, bound)
    bias_conv = jax.random.uniform(kb, (COUT,), jnp.float32, -bound, bound)

    out, mean, var = bn_fire_conv(x, weight_bn, bias_bn, weight_conv, bias_conv)
    out = jax.block_until_ready(out)

    # TODO(synk): running_mean/var update in the torch module is a parameter
    # mutation side-effect (does not touch the returned tensor); reproduced
    # here in plain JAX for fidelity.
    factor = x.size / CIN
    factor = factor / (factor - 1.0)
    new_running_var = 1.0 * 0.9 + var * (0.1 * factor)
    new_running_mean = 0.0 * 0.9 + mean * 0.1
    del new_running_var, new_running_mean

    assert out.shape == (T, B, COUT, H, W)

    # stats kernel check (biased, matches torch.var_mean(unbiased=False)).
    ref_mean = jnp.mean(x, axis=(0, 1, 3, 4))
    ref_var = jnp.var(x, axis=(0, 1, 3, 4))
    assert float(jnp.max(jnp.abs(mean - ref_mean))) < 1e-5, "mean mismatch"
    assert float(jnp.max(jnp.abs(var - ref_var))) < 1e-4, "var mismatch"

    # tight check: reference using the same stats and bf16-rounded conv weights
    # (spikes/masks are exact {0,1}, so only weight rounding differs from f32).
    wc_bf16 = weight_conv.astype(jnp.bfloat16).astype(jnp.float32)
    ref_tight = reference(x, weight_bn, bias_bn, wc_bf16, bias_conv,
                          mean=mean, var=var)
    err_tight = float(jnp.max(jnp.abs(out - ref_tight)))
    # loose sanity check vs the exact f32-weight reference.
    ref_full = reference(x, weight_bn, bias_bn, weight_conv, bias_conv,
                         mean=mean, var=var)
    err_full = float(jnp.max(jnp.abs(out - ref_full)))

    if err_tight < 1e-3 and err_full < 2e-2:
        print("KERNEL_OK")
    else:
        raise SystemExit(
            f"mismatch vs reference: tight={err_tight} full={err_full}")
</pallas_src>

<mosaic_0001>
module attributes {stable_mosaic.version = 11 : i64} {
  func.func @_stats_kernel(%arg0: i32, %arg1: i32, %arg2: memref<2x4x256xf32, #tpu.memory_space<vmem>>, %arg3: memref<1x4x1xf32, #tpu.memory_space<vmem>>, %arg4: memref<1x4x1xf32, #tpu.memory_space<vmem>>) attributes {dimension_semantics = [#tpu.dimension_semantics<parallel>, #tpu.dimension_semantics<arbitrary>], iteration_bounds = array<i64: 2, 1>, scalar_prefetch = 0 : i64, scratch_operands = 0 : i64, tpu.core_type = #tpu.core_type<tc>, window_params = [{transform_indices = @transform_0, window_bounds = array<i64: 2, 4, 256>}, {transform_indices = @transform_1, window_bounds = array<i64: 1, 4, 1>}, {transform_indices = @transform_2, window_bounds = array<i64: 1, 4, 1>}]} {
    %c0_i32 = arith.constant 0 : i32
    %0 = arith.cmpi eq, %arg1, %c0_i32 : i32
    %1 = arith.extui %0 : i1 to i32
    %c0_i32_0 = arith.constant 0 : i32
    %2 = arith.cmpi ne, %1, %c0_i32_0 : i32
    scf.if %2 {
      %cst_18 = arith.constant 0.000000e+00 : f32
      %23 = vector.broadcast %cst_18 : f32 to vector<1x4x1xf32>
      %c0_19 = arith.constant 0 : index
      %c0_20 = arith.constant 0 : index
      %c0_21 = arith.constant 0 : index
      %24 = vector.load %arg3[%c0_19, %c0_20, %c0_21] : memref<1x4x1xf32, #tpu.memory_space<vmem>>, vector<1x4x1xf32>
      tpu.vector_store %arg3[%c0_19, %c0_20, %c0_21], %23 {strides = array<i32>} : memref<1x4x1xf32, #tpu.memory_space<vmem>>, vector<1x4x1xf32>,
      %cst_22 = arith.constant 0.000000e+00 : f32
      %25 = vector.broadcast %cst_22 : f32 to vector<1x4x1xf32>
      %c0_23 = arith.constant 0 : index
      %c0_24 = arith.constant 0 : index
      %c0_25 = arith.constant 0 : index
      %26 = vector.load %arg4[%c0_23, %c0_24, %c0_25] : memref<1x4x1xf32, #tpu.memory_space<vmem>>, vector<1x4x1xf32>
      tpu.vector_store %arg4[%c0_23, %c0_24, %c0_25], %25 {strides = array<i32>} : memref<1x4x1xf32, #tpu.memory_space<vmem>>, vector<1x4x1xf32>,
    } else {
    }
    %c0 = arith.constant 0 : index
    %c0_1 = arith.constant 0 : index
    %c0_2 = arith.constant 0 : index
    %3 = vector.load %arg2[%c0, %c0_1, %c0_2] : memref<2x4x256xf32, #tpu.memory_space<vmem>>, vector<2x4x256xf32>
    %cst = arith.constant dense<0.000000e+00> : vector<4x256xf32>
    %4 = vector.multi_reduction <add>, %3, %cst [0] : vector<2x4x256xf32> to vector<4x256xf32>
    %5 = arith.mulf %3, %3 : vector<2x4x256xf32>
    %cst_3 = arith.constant dense<0.000000e+00> : vector<4x256xf32>
    %6 = vector.multi_reduction <add>, %5, %cst_3 [0] : vector<2x4x256xf32> to vector<4x256xf32>
    %c0_4 = arith.constant 0 : index
    %c0_5 = arith.constant 0 : index
    %c0_6 = arith.constant 0 : index
    %7 = vector.load %arg3[%c0_4, %c0_5, %c0_6] : memref<1x4x1xf32, #tpu.memory_space<vmem>>, vector<1x4x1xf32>
    %8 = vector.shape_cast %7 : vector<1x4x1xf32> to vector<4x1xf32>
    %cst_7 = arith.constant dense<0.000000e+00> : vector<4xf32>
    %9 = vector.multi_reduction <add>, %4, %cst_7 [1] : vector<4x256xf32> to vector<4xf32>
    %10 = vector.shape_cast %9 : vector<4xf32> to vector<4x1xf32>
    %11 = arith.addf %8, %10 : vector<4x1xf32>
    %c0_8 = arith.constant 0 : index
    %c0_9 = arith.constant 0 : index
    %c0_10 = arith.constant 0 : index
    %12 = vector.load %arg3[%c0_8, %c0_9, %c0_10] : memref<1x4x1xf32, #tpu.memory_space<vmem>>, vector<1x4x1xf32>
    %13 = vector.shape_cast %12 : vector<1x4x1xf32> to vector<4x1xf32>
    %14 = vector.shape_cast %11 : vector<4x1xf32> to vector<1x4x1xf32>
    tpu.vector_store %arg3[%c0_8, %c0_9, %c0_10], %14 {strides = array<i32>} : memref<1x4x1xf32, #tpu.memory_space<vmem>>, vector<1x4x1xf32>,
    %c0_11 = arith.constant 0 : index
    %c0_12 = arith.constant 0 : index
    %c0_13 = arith.constant 0 : index
    %15 = vector.load %arg4[%c0_11, %c0_12, %c0_13] : memref<1x4x1xf32, #tpu.memory_space<vmem>>, vector<1x4x1xf32>
    %16 = vector.shape_cast %15 : vector<1x4x1xf32> to vector<4x1xf32>
    %cst_14 = arith.constant dense<0.000000e+00> : vector<4xf32>
    %17 = vector.multi_reduction <add>, %6, %cst_14 [1] : vector<4x256xf32> to vector<4xf32>
    %18 = vector.shape_cast %17 : vector<4xf32> to vector<4x1xf32>
    %19 = arith.addf %16, %18 : vector<4x1xf32>
    %c0_15 = arith.constant 0 : index
    %c0_16 = arith.constant 0 : index
    %c0_17 = arith.constant 0 : index
    %20 = vector.load %arg4[%c0_15, %c0_16, %c0_17] : memref<1x4x1xf32, #tpu.memory_space<vmem>>, vector<1x4x1xf32>
    %21 = vector.shape_cast %20 : vector<1x4x1xf32> to vector<4x1xf32>
    %22 = vector.shape_cast %19 : vector<4x1xf32> to vector<1x4x1xf32>
    tpu.vector_store %arg4[%c0_15, %c0_16, %c0_17], %22 {strides = array<i32>} : memref<1x4x1xf32, #tpu.memory_space<vmem>>, vector<1x4x1xf32>,
    return
  }
  func.func @transform_0(%arg0: i32, %arg1: i32) -> (i32, i32, i32) {
    %c0_i32 = arith.constant 0 : i32
    %c0_i32_0 = arith.constant 0 : i32
    return %arg0, %c0_i32, %arg1 : i32, i32, i32
  }
  func.func @transform_1(%arg0: i32, %arg1: i32) -> (i32, i32, i32) {
    %c0_i32 = arith.constant 0 : i32
    %c0_i32_0 = arith.constant 0 : i32
    %c0_i32_1 = arith.constant 0 : i32
    return %arg0, %c0_i32, %c0_i32_0 : i32, i32, i32
  }
  func.func @transform_2(%arg0: i32, %arg1: i32) -> (i32, i32, i32) {
    %c0_i32 = arith.constant 0 : i32
    %c0_i32_0 = arith.constant 0 : i32
    %c0_i32_1 = arith.constant 0 : i32
    return %arg0, %c0_i32, %c0_i32_0 : i32, i32, i32
  }
}

</mosaic_0001>

<bundles_post_ra>
// kernel: tpu_custom_call.1
= control target key start
LH: loop header
LB: loop body
LE: loop exit
PB: predicated region body
PF: predicated region fallthrough
CT: control target
= control target key end

     0   :  { %8 = vsyncpa [#allocation3], 0  ;;  %s654_s0 = inlined_call_operand.hbm [shape: f32[4,4,256], index: 0, kind: input, shape index: {}]   ;;  %s655_s1 = inlined_call_operand.vmem [shape: f32[2,4,1], index: 1, kind: output, shape index: {0}]   ;;  %s656_s2 = inlined_call_operand.vmem [shape: f32[2,4,1], index: 2, kind: output, shape index: {1}]  }
   0x1   :  { %10 = vsyncpa [#allocation3 + $0x1], 0  ;;  %s527_s9 = smov 0   ;;  %s529_s10 = smov 0  }
   0x2   :  { %s531_s11 = smov 0   ;;  %s533_s12 = smov 0  }
   0x3   :  { %s535_s13 = smov 0   ;;  %s537_s14 = smov 0  }
   0x4 LB: > { %s352_s15 = sadd.s32 4294967295, %s506_s14   ;;  %s28_s16 = sadd.s32 1, %s502_s13  ;;  %s506_s14 = sphi %s537_s14, %s16_s14   ;;  %s502_s13 = sphi %s535_s13, %s664_s13   ;;  %s498_s12 = sphi %s533_s12, %s663_s12   ;;  %s494_s11 = sphi %s531_s11, %s662_s11   ;;  %s490_s10 = sphi %s529_s10, %s661_s10   ;;  %s486_s9 = sphi %s527_s9, %s660_s9  }
   0x5   : > { %p30_p0 = scmp.ge.s32.totalorder %s28_s16, 2  ;;  %s37_s17 = sadd.s32 1, %s494_s11 }
   0x6   : > { %p44_p1 = scmp.ne.s32.totalorder %s494_s11, %s490_s10  ;;  %p45_p2 = scmp.eq.s32.totalorder %s506_s14, 0 }
   0x7   : > { %s666_s16 = smov (%p30_p0, %s28_s16), 0  ;;  %p50_p4 = scmp.ne.s32.totalorder %s490_s10, %s486_s9 }
   0x8   : > { %p563_p3 = por %p45_p2, %p44_p1  ;;  %s32_s19 = ssub.s32 %s502_s13, %s666_s16 }
   0x9   : > { %p51_p5 = scmp.eq.s32.totalorder %s352_s15, 0  ;;  %p35_p6 = scmp.eq.s32.totalorder %s32_s19, 0 }
   0xa   : > { %p374_p8 = scmp.lt.s32.totalorder %s506_s14, 2  ;;  %s126_s22 = sand.u32 1, %s494_s11  }
   0xb   : > { %p570_p7 = por %p51_p5, %p50_p4  ;;  %s367_s23 = sshll.u32 %s502_s13, 8 }
   0xc   : > { %s576_s21 = scalar_select %p35_p6, %s494_s11, %s37_s17  }
   0xd   : > { %s356_s24 = sshll.u32 %s126_s22, 4  ;;  %s139_s27 = scalar_lea.hbm %s654_s0, %s367_s23 }
   0xe   : > { %s130_s28 = scalar_lea.vmem [#allocation2], %s356_s24  ;;  %p585_p9 = pnand %p374_p8, %p563_p3 }
   0xf   : > { %s140_s29 = sshll.u32 %s130_s28, 4  ;;  %s127_s3 = scalar_lea.sflag [#allocation3], %s126_s22  ;;  %s141_s29 = int_to_ptr.vmem [resolvable:$true] %s140_s29 }
  0x10   : > { %p430_p10 = pneg %p585_p9  ;;  %s441_s4 = scalar_lea.vmem %s141_s29, 256 }
  0x11   : > { %p442_p11 = scmp.ne.s32.totalorder %s141_s29, %s441_s4  ;;  %s508_s5 = smov [#allocation2]  }
  0x12   : > { %s446_s6 = sshll.u32 %s508_s5, 4  ;;  %s447_s6 = int_to_ptr.vmem [resolvable:$false] %s446_s6 }
  0x13   : > { %p444_p12 = pnand %p442_p11, %p430_p10  ;;  %s448_s7 = scalar_lea.vmem %s447_s6, 512 }
  0x14   : > { %p449_p0 = scmp.lt.s32.totalorder %s141_s29, %s447_s6  ;;  %p450_p1 = scmp.lt.s32.totalorder %s448_s7, %s441_s4 }
  0x15   : > { %p445_p13 = pneg %p444_p12 }
  0x16   : > { %p451_p2 = por %p450_p1, %p449_p0 }
  0x18   : > { %p452_p3 = pnand %p451_p2, %p445_p13 }
  0x1a   : > { %455 = shalt.err (!%p452_p3)
}
  0x1b   : > { %s509_s8 = smov 128   ;;  %s510_s9 = smov 8  }
  0x1c   : > { %373 = dma.hbm_to_vmem [thread:$0]  (!%p585_p9), %s139_s27, 256, %s141_s29, %s127_s3, %s509_s8, %s509_s8, %s510_s9  }
  0x1d   : > { %p360_p4 = scmp.ge.s32.totalorder %s506_s14, 1  ;;  %p148_p5 = scmp.lt.s32.totalorder %s506_s14, 3 }
  0x1f   : > { %p149_p6 = pnand %p360_p4, %p148_p5 }
  0x20   : > { %s154_s15 = sand.u32 (!%p149_p6), 1, %s490_s10  }
  0x21   : > { %152 = sbr.rel (%p149_p6) target bundleno = 194 (0xc2), region = 24  ;;  %s361_s17 = sshll.u32 (!%p149_p6), %s154_s15, 4 }
  0x22   : > { %s155_s18 = scalar_lea.sflag (!%p149_p6), [#allocation3], %s154_s15  ;;  %s158_s19 = scalar_lea.vmem (!%p149_p6), [#allocation2], %s361_s17 }
  0x26   : > { %481 = dma.done.wait (%p570_p7), %s155_s18, 256  }
  0x27   : > { %483 = vsyncadd (%p570_p7), %s155_s18, 4294967040  ;;  %p184_p8 = scmp.lt.s32.totalorder %s498_s12, 1  ;;  %vm196_vm0 = vcmask 3072   ;;  %vm207_vm1 = vcmask 1043456   ;;  %v511_v0 = vmov 0.0   ;;  %v199_v1 = vld [vmem:[%s158_s19] sm:$0xff] }
  0x28   : > { %v200_v2 = vld [vmem:[%s158_s19 + $0x8] sm:$0xff]  ;;  %v203_v3 = vcombine.high %v199_v1, %v199_v1  ;;  %v208_v5 = vsel %vm207_vm1, %v199_v1, 0.0  ;;  %v214_v8 = vmul.f32 %v199_v1, %v199_v1 }
  0x29   : > { %s668_s12 = smov (!%p184_p8, %s498_s12), 1  ;;  %v204_v4 = vcombine.high %v200_v2, %v200_v2  ;;  %v209_v6 = vsel %vm207_vm1, %v200_v2, 0.0  ;;  %v215_v9 = vmul.f32 %v200_v2, %v200_v2 }
  0x2a   : > { %s362_s22 = sshll.u32 %s668_s12, 2  ;;  %v210_v7 = vadd.f32 %v209_v6, %v208_v5  ;;  %v211_v10 = vsel %vm207_vm1, %v203_v3, 0.0  ;;  %v218_v14 = vcombine.high %v214_v8, %v214_v8  ;;  %v222_v16 = vsel %vm207_vm1, %v214_v8, 0.0 }
  0x2b   : > { %s610_s25 = scalar_lea.vmem %s655_s1, %s362_s22  ;;  %v212_v11 = vsel %vm207_vm1, %v204_v4, 0.0  ;;  %v219_v15 = vcombine.high %v215_v9, %v215_v9  ;;  %v223_v17 = vsel %vm207_vm1, %v215_v9, 0.0  ;;  %s191_s27 = scalar_lea.vmem %s656_s2, %s362_s22 }
  0x2c   : > { %197 = vst.msk [vmem:[%s610_s25] sm:$0xf] %vm196_vm0, %v511_v0  ;;  %v213_v12 = vadd.f32 %v212_v11, %v211_v10  ;;  %v229_v13 = vsel %vm207_vm1, %v210_v7, 0.0  ;;  %v224_v19 = vadd.f32 %v223_v17, %v222_v16  ;;  %v225_v20 = vsel %vm207_vm1, %v218_v14, 0.0  ;;  %198 = vst.msk [vmem:[%s191_s27] sm:$0xf] %vm196_vm0, %v511_v0 }
  0x2d   : > { %v226_v21 = vsel %vm207_vm1, %v219_v15, 0.0 }
  0x2e   : > { %v230_v18 = vsel %vm207_vm1, %v213_v12, 0.0  ;;  %v227_v23 = vadd.f32 %v226_v21, %v225_v20  ;;  %v238_v24 = vsel %vm207_vm1, %v224_v19, 0.0 }
  0x2f   : > { %v231_v22 = vadd.f32 %v230_v18, %v229_v13 }
  0x30   : > { %v239_v25 = vsel %vm207_vm1, %v227_v23, 0.0 }
  0x31   : > { %232 = vadd.xlane.f32.xlu0 %v231_v22  ;;  %v240_v26 = vadd.f32 %v239_v25, %v238_v24 }
  0x33   : > { %v228_v27 = vld [vmem:[%s610_s25] sm:$0xf] }
  0x34   : > { %v237_v30 = vld [vmem:[%s191_s27] sm:$0xf] }
  0x35   : > { %241 = vadd.xlane.f32.xlu0 %v240_v26 }
  0xba   : > { %v233_v28 = vpop.xlane.xlu0 %232 }
  0xbb   : > { %v234_v29 = vadd.f32 %v233_v28, %v228_v27 }
  0xbd   : > { %236 = vst.msk [vmem:[%s610_s25] sm:$0xf] %vm196_vm0, %v234_v29 }
  0xbe   : > { %v242_v31 = vpop.xlane.xlu0 %241 }
  0xbf   : > { %v243_v32 = vadd.f32 %v242_v31, %v237_v30 }
  0xc1   : > { %244 = vst.msk [vmem:[%s191_s27] sm:$0xf] %vm196_vm0, %v243_v32 }
  0xc2 PF: > { %s16_s14 = sadd.s32 1, %s506_s14   ;;  %s660_s9 = smov %s490_s10 }
  0xc3   : > { %p13_p7 = scmp.ge.s32.totalorder %s16_s14, 4   ;;  %s661_s10 = smov %s494_s11 }
  0xc4   : > { %s662_s11 = smov %s576_s21  ;;  %s663_s12 = smov %s502_s13 }
  0xc5   : > { %s664_s13 = smov %s666_s16  ;;  %15 = sbr.rel (!%p13_p7) target bundleno = 4 (0x4), region = 80 }
  0xca   :  { %278 = vsyncpa [#allocation3], 1 }
  0xcb   :  { %280 = vsyncpa [#allocation3 + $0x1], 1 }

</bundles_post_ra>
